<compile_context>
chip_gen: v7x
topology: tpu7x:2x2x1
jax: 0.10.0
libtpu: 0.0.40
codegen_flags: <defaults>
</compile_context>

<pallas_src>
import functools

import jax
import jax.numpy as jnp
from jax.experimental import pallas as pl
from jax.experimental.pallas import tpu as pltpu


def _round_up(x, n):
    return ((x + n - 1) // n) * n


def _shared_block_gru_kernel(x_ref, h_ref, gum_ref, wi_ref, wh_ref, bi_ref,
                             bh_ref, bl_ref, rep_ref, seg_ref, gat_ref,
                             segrow_ref, hnext_ref, att_ref,
                             *, k, n_templates, gate_stride, t_pad):
    """One row-block of the forward pass (all k blocks batched on the MXU).

    x_ref      (rb, ninp)         un-repeated input rows
    h_ref      (k, rb, m)   f32   hidden blocks, k leading (free merge to (k*rb, m))
    gum_ref    (k, rb, t_pad)     pre-sampled Gumbel(0,1) noise (lane padded)
    wi_ref     (ninp, 3*G)        packed input weights, gate stride G = round_up(T*m,128)
    wh_ref     (m, 3*G)           packed hidden weights
    bi_ref     (1, 3*G)           packed input biases   (f32)
    bh_ref     (1, 3*G)           packed hidden biases  (f32)
    bl_ref     (m, G)             folded bilinear read/write keys B_t = wr @ ww_t^T
    rep_ref    (m, G)             lane-replication matrix  rep[c, t*m+c] = 1
    seg_ref    (G, t_pad)  f32    segment-sum indicator (lane t*m+c -> template t)
    gat_ref    (G, m)      f32    channel-gather indicator (lane t*m+c -> channel c)
    segrow_ref (1, G)      int32  template id per lane (T on padded lanes)
    hnext_ref  (k, rb, m)         output hidden (natural layout, permuted in wrapper)
    att_ref    (k, rb, t_pad)     output one-hot attention (lane padded)
    """
    f32 = jnp.float32
    T = n_templates
    G = gate_stride
    rb = x_ref.shape[0]
    m = h_ref.shape[-1]
    N = k * rb
    cdt = wi_ref.dtype

    x = x_ref[...]
    hf32 = h_ref[...].reshape(N, m)        # free leading-dim merge (rb % 8 == 0)
    hc = hf32.astype(cdt)                  # MXU operand (bf16 optional; carry stays f32)

    # Input-side gates ONCE per batch row; hidden-side gates for all k blocks x
    # T templates in ONE lane-dense matmul each.
    gi = jnp.dot(x, wi_ref[...], preferred_element_type=f32) + bi_ref[...]    # (rb, 3G)
    gh = jnp.dot(hc, wh_ref[...], preferred_element_type=f32) + bh_ref[...]   # (N, 3G)

    def add_gi(a, b):                      # broadcast per-row gi over the k blocks
        return (a.reshape(k, rb, G) + b[None]).reshape(N, G)

    sig = lambda v: 0.5 * jnp.tanh(0.5 * v) + 0.5   # == sigmoid, single transcendental
    r = sig(add_gi(gh[:, 0 * G:1 * G], gi[:, 0 * G:1 * G]))
    z = sig(add_gi(gh[:, 1 * G:2 * G], gi[:, 1 * G:2 * G]))
    n = jnp.tanh(add_gi(r * gh[:, 2 * G:3 * G], gi[:, 2 * G:3 * G]))
    new_part = (1.0 - z) * n                                              # (N, G)

    # Lane replication of h across templates via the MXU (no concat/shuffles);
    # only needed for the attention logits.
    rep = jnp.dot(hc, rep_ref[...], preferred_element_type=f32)           # (N, G)
    hn_all = new_part + z * rep

    # Attention logits: folded bilinear read/write keys + segment-sum matmul.
    proj = jnp.dot(hc, bl_ref[...], preferred_element_type=f32)           # (N, G)
    logits = jnp.dot(proj * hn_all, seg_ref[...],
                     preferred_element_type=f32)                          # (N, t_pad)

    # Hard Gumbel-softmax (tau = 1): one-hot of the first argmax of logits+noise.
    lane = jax.lax.broadcasted_iota(jnp.int32, (N, t_pad), 1)
    pert = logits + gum_ref[...].reshape(N, t_pad)
    pert = jnp.where(lane < T, pert, -jnp.inf)
    mx = jnp.max(pert, axis=-1, keepdims=True)
    idx = jnp.min(jnp.where(pert >= mx, lane, t_pad), axis=-1, keepdims=True)
    att = (lane == idx).astype(f32)                                       # (N, t_pad)

    # Winner selection: lane mask + gather matmuls.  The carry term z*h is folded
    # so the recurrent state is never lane-replicated (and stays exact f32).
    sel = (segrow_ref[...] == idx).astype(f32)                            # (N, G)
    gat = gat_ref[...]
    hn_new = jnp.dot(sel * new_part, gat, preferred_element_type=f32)     # (N, m)
    z_sel = jnp.dot(sel * z, gat, preferred_element_type=f32)             # (N, m)
    hn_sel = hn_new + z_sel * hf32

    hnext_ref[...] = hn_sel.reshape(k, rb, m)
    att_ref[...] = att.reshape(k, rb, t_pad)


class OldSharedBlockGRUPallas:
    """Deterministically-initialized JAX/Pallas port of OldSharedBlockGRU."""

    def __init__(self, ninp, nhid, k, n_templates, key, *,
                 block_rows=256, compute_dtype=jnp.float32):
        assert ninp % k == 0 and nhid % k == 0
        self.ninp = ninp
        self.nhid = nhid
        self.k = k
        self.m = nhid // k
        self.n_templates = n_templates
        self.block_rows = max(8, _round_up(int(block_rows), 8))
        # bf16 matmul operands are fine on v5e/v6e/v7x (MXU accumulates in f32);
        # the recurrent carry and all nonlinearities stay f32 regardless.
        self.compute_dtype = compute_dtype

        m, T = self.m, n_templates
        Tm = T * m
        G = _round_up(Tm, 128)             # per-gate lane stride (128-aligned)
        TP = _round_up(T, 128)             # attention lane width (128-aligned)
        self.gate_stride = G
        self.t_pad = TP

        try:
            self._vmem_cap = int(pltpu.get_tpu_info().vmem_capacity_bytes)
        except Exception:
            self._vmem_cap = 64 * 2 ** 20  # conservative (v7x) fallback

        keys = jax.random.split(key, 6)
        bound = 1.0 / float(m) ** 0.5      # nn.GRUCell default init

        w_ih = jax.random.uniform(keys[0], (T, 3 * m, ninp), jnp.float32, -bound, bound)
        w_hh = jax.random.uniform(keys[1], (T, 3 * m, m), jnp.float32, -bound, bound)
        b_ih = jax.random.uniform(keys[2], (T, 3 * m), jnp.float32, -bound, bound)
        b_hh = jax.random.uniform(keys[3], (T, 3 * m), jnp.float32, -bound, bound)
        # GroupLinearLayer weights: 0.01 * randn(num_blocks, din, dout)
        w_read = 0.01 * jax.random.normal(keys[4], (1, m, 16), jnp.float32)
        w_write = 0.01 * jax.random.normal(keys[5], (T, m, 16), jnp.float32)
        self._raw = (w_ih, w_hh, b_ih, b_hh, w_read, w_write)   # pure-JAX reference

        # --- lane-dense, 128-aligned packing: lane index = gate*G + t*m + c ---
        def pack_w(w):                     # (T, 3m, din) -> (din, 3*G)
            din = w.shape[-1]
            w4 = jnp.transpose(w.reshape(T, 3, m, din), (3, 1, 0, 2)).reshape(din, 3, Tm)
            w4 = jnp.pad(w4, ((0, 0), (0, 0), (0, G - Tm)))
            return w4.reshape(din, 3 * G)

        def pack_b(b):                     # (T, 3m) -> (1, 3*G)
            b3 = jnp.transpose(b.reshape(T, 3, m), (1, 0, 2)).reshape(3, Tm)
            b3 = jnp.pad(b3, ((0, 0), (0, G - Tm)))
            return b3.reshape(1, 3 * G)

        self.wi_all = pack_w(w_ih).astype(compute_dtype)
        self.wh_all = pack_w(w_hh).astype(compute_dtype)
        self.bi_all = pack_b(b_ih)                       # f32
        self.bh_all = pack_b(b_hh)                       # f32

        # Folded bilinear read/write keys: B_t = wr @ ww_t^T, stacked to (m, G).
        bl = jnp.einsum('as,tbs->atb', w_read[0], w_write).reshape(m, Tm)
        self.bilinear = jnp.pad(bl, ((0, 0), (0, G - Tm))).astype(compute_dtype)

        # Lane-replication matrix: rep[c, t*m + c] = 1 (h broadcast to all templates).
        rep = jnp.tile(jnp.eye(m, dtype=jnp.float32), (1, T))
        self.rep_mat = jnp.pad(rep, ((0, 0), (0, G - Tm))).astype(compute_dtype)

        # Indicator matrices for segment-sum / gather (exact 0/1, kept f32).
        seg_ids = jnp.repeat(jnp.arange(T), m)                                   # (Tm,)
        seg = (seg_ids[:, None] == jnp.arange(T)[None, :]).astype(jnp.float32)   # (Tm, T)
        self.seg_mat = jnp.pad(seg, ((0, G - Tm), (0, TP - T)))                  # (G, TP)
        gat = jnp.tile(jnp.eye(m, dtype=jnp.float32), (T, 1))                    # (Tm, m)
        self.gather_mat = jnp.pad(gat, ((0, G - Tm), (0, 0)))                    # (G, m)
        self.seg_row = jnp.pad(seg_ids.astype(jnp.int32), (0, G - Tm),
                               constant_values=T)[None, :]                       # (1, G)

    @functools.partial(jax.jit, static_argnums=0)
    def _run(self, x, h, gumbel):
        bs = x.shape[0]
        k, m, T = self.k, self.m, self.n_templates
        G, TP = self.gate_stride, self.t_pad
        ninp, nhid = self.ninp, self.nhid
        cdt = self.compute_dtype
        cdt_b = jnp.dtype(cdt).itemsize

        # ---- VMEM-aware row-block choice (>= 2 grid steps when possible) ----
        soft_cap = int(0.70 * self._vmem_cap)            # ~45 MiB v7x, ~90 MiB v5e/v6e
        # Resident weights (x2: default double-buffering of constant-index blocks).
        # NOTE: on v7x this could be halved with pipeline_mode=pl.Buffered(1).
        res_bytes = 2 * (cdt_b * (ninp * 3 * G + m * 3 * G + 2 * m * G)
                         + 4 * (2 * 3 * G + G * TP + G * m + G))

        def footprint(rb_):
            n_ = k * rb_
            io = 2 * (cdt_b * rb_ * ninp + 4 * n_ * (2 * m + 2 * TP))     # blocks, x2 buf
            mid = 4 * (rb_ * 3 * G + n_ * (3 * G + 10 * G + 4 * TP + 4 * m))  # f32 temps
            return res_bytes + io + mid

        rb = min(self.block_rows, max(8, _round_up((bs + 1) // 2, 8)))
        while rb > 8 and footprint(rb) > soft_cap:
            rb = max(8, _round_up(rb // 2, 8))
        bs_pad = _round_up(bs, rb)
        pad = bs_pad - bs

        x_p = jnp.pad(x, ((0, pad), (0, 0))).astype(cdt)                     # (bs_pad, ninp)
        # h stays f32 end-to-end (exact recurrent carry); k-leading layout so the
        # in-kernel (k, rb, m) -> (k*rb, m) merge is a free view.
        h_kbm = jnp.transpose(h.reshape(bs, k, m), (1, 0, 2))
        h_p = jnp.pad(h_kbm, ((0, 0), (0, pad), (0, 0))).astype(jnp.float32)  # (k, bs_pad, m)
        g_kbt = jnp.transpose(gumbel, (1, 0, 2))                             # (k, bs, T)
        g_p = jnp.pad(g_kbt, ((0, 0), (0, pad), (0, TP - T)))                # (k, bs_pad, TP)

        grid = (bs_pad // rb,)

        def resident(shape):
            return pl.BlockSpec(shape, lambda i, _z=(0,) * len(shape): _z)

        in_specs = [
            pl.BlockSpec((rb, ninp), lambda i: (i, 0)),          # x
            pl.BlockSpec((k, rb, m), lambda i: (0, i, 0)),       # h (k leading)
            pl.BlockSpec((k, rb, TP), lambda i: (0, i, 0)),      # gumbel noise
            resident((ninp, 3 * G)),                             # Wi_all
            resident((m, 3 * G)),                                # Wh_all
            resident((1, 3 * G)),                                # bi_all
            resident((1, 3 * G)),                                # bh_all
            resident((m, G)),                                    # bilinear
            resident((m, G)),                                    # rep_mat
            resident((G, TP)),                                   # seg_mat
            resident((G, m)),                                    # gather_mat
            resident((1, G)),                                    # seg_row
        ]
        out_specs = (
            pl.BlockSpec((k, rb, m), lambda i: (0, i, 0)),       # hnext (natural layout)
            pl.BlockSpec((k, rb, TP), lambda i: (0, i, 0)),      # att   (lane padded)
        )
        out_shape = (
            jax.ShapeDtypeStruct((k, bs_pad, m), jnp.float32),
            jax.ShapeDtypeStruct((k, bs_pad, TP), jnp.float32),
        )

        # Advisory cost estimate for the XLA scheduler.
        n_tot = k * bs_pad
        flops = 2 * (bs_pad * ninp * 3 * G
                     + n_tot * (m * 3 * G + 2 * m * G + G * TP + 2 * G * m))
        transcendentals = 3 * n_tot * G
        bytes_accessed = (res_bytes // 2 + cdt_b * bs_pad * ninp
                          + 4 * n_tot * (2 * m + 2 * TP))
        cost = pl.CostEstimate(flops=flops, transcendentals=transcendentals,
                               bytes_accessed=bytes_accessed)

        need = footprint(rb)
        vmem_limit = max(32 * 2 ** 20, min(soft_cap, int(1.25 * need)))
        if vmem_limit < need:
            vmem_limit = min(int(0.90 * self._vmem_cap), int(1.1 * need))

        kernel = functools.partial(_shared_block_gru_kernel, k=k, n_templates=T,
                                   gate_stride=G, t_pad=TP)

        hnext_kbm, att_kbt = pl.pallas_call(
            kernel,
            grid=grid,
            in_specs=in_specs,
            out_specs=out_specs,
            out_shape=out_shape,
            compiler_params=pltpu.CompilerParams(
                dimension_semantics=("parallel",),
                vmem_limit_bytes=vmem_limit),
            cost_estimate=cost,
        )(x_p, h_p, g_p, self.wi_all, self.wh_all, self.bi_all, self.bh_all,
          self.bilinear, self.rep_mat, self.seg_mat, self.gather_mat, self.seg_row)

        # Cheap one-shot permutes in the wrapper (kernel stores stay full-width).
        hnext = jnp.transpose(hnext_kbm[:, :bs], (1, 0, 2)).reshape(bs, nhid)
        att = jnp.transpose(att_kbt[:, :bs, :T], (1, 0, 2))                  # (bs, k, T)
        return hnext, att

    def __call__(self, inputs, h, noise_key):
        bs = h.shape[0]
        gumbel = jax.random.gumbel(
            noise_key, (bs, self.k, self.n_templates), jnp.float32)
        return self._run(inputs, h, gumbel)

    # Pure-JAX reference mirroring the PyTorch module (for validation only).
    def reference(self, inputs, h, noise_key):
        w_ih, w_hh, b_ih, b_hh, w_read, w_write = self._raw
        bs = h.shape[0]
        k, m, T = self.k, self.m, self.n_templates
        hb = h.reshape(bs * k, m)
        xr = jnp.repeat(inputs, k, axis=0)
        gumbel = jax.random.gumbel(noise_key, (bs, k, T), jnp.float32).reshape(bs * k, T)
        h_read = hb @ w_read[0]                                  # (N, 16)
        hn = []
        for t in range(T):
            gi = xr @ w_ih[t].T + b_ih[t]
            gh = hb @ w_hh[t].T + b_hh[t]
            r = jax.nn.sigmoid(gi[:, :m] + gh[:, :m])
            z = jax.nn.sigmoid(gi[:, m:2 * m] + gh[:, m:2 * m])
            n = jnp.tanh(gi[:, 2 * m:] + r * gh[:, 2 * m:])
            hn.append((1.0 - z) * n + z * hb)
        hn = jnp.stack(hn, axis=1)                               # (N, T, m)
        wk = jnp.einsum('ntm,tmo->nto', hn, w_write)             # (N, T, 16)
        logits = jnp.einsum('no,nto->nt', h_read, wk)            # (N, T)
        att = jax.nn.one_hot(jnp.argmax(logits + gumbel, axis=-1), T, dtype=jnp.float32)
        hnext = jnp.einsum('nt,ntm->nm', att, hn)
        return hnext.reshape(bs, self.nhid), att.reshape(bs, k, T)


if __name__ == "__main__":
    # Small shapes consistent with the module: bs=16, ninp=16, nhid=32, k=4 -> m=8, T=4.
    bs, ninp, nhid, k, n_templates = 16, 16, 32, 4, 4

    root = jax.random.PRNGKey(0)
    k_params, k_x, k_h, k_noise = jax.random.split(root, 4)

    model = OldSharedBlockGRUPallas(ninp, nhid, k, n_templates, k_params)

    x = jax.random.normal(k_x, (bs, ninp), jnp.float32)
    h = jax.random.normal(k_h, (bs, nhid), jnp.float32)

    hnext, att = model(x, h, k_noise)
    jax.block_until_ready((hnext, att))

    assert hnext.shape == (bs, nhid)
    assert att.shape == (bs, k, n_templates)
    assert bool(jnp.all(jnp.sum(att, axis=-1) == 1.0))            # hard one-hot rows

    ref_hnext, ref_att = model.reference(x, h, k_noise)
    assert bool(jnp.array_equal(att, ref_att)), "attention mismatch vs reference"
    err = float(jnp.max(jnp.abs(hnext - ref_hnext)))
    assert err < 1e-4, f"hnext mismatch vs reference: {err}"

    print("KERNEL_OK")
</pallas_src>

<mosaic_0001>
module attributes {stable_mosaic.version = 11 : i64} {
  func.func @_shared_block_gru_kernel(%arg0: i32, %arg1: memref<8x16xf32, #tpu.memory_space<vmem>>, %arg2: memref<4x8x8xf32, #tpu.memory_space<vmem>>, %arg3: memref<4x8x128xf32, #tpu.memory_space<vmem>>, %arg4: memref<16x384xf32, #tpu.memory_space<vmem>>, %arg5: memref<8x384xf32, #tpu.memory_space<vmem>>, %arg6: memref<1x384xf32, #tpu.memory_space<vmem>>, %arg7: memref<1x384xf32, #tpu.memory_space<vmem>>, %arg8: memref<8x128xf32, #tpu.memory_space<vmem>>, %arg9: memref<8x128xf32, #tpu.memory_space<vmem>>, %arg10: memref<128x128xf32, #tpu.memory_space<vmem>>, %arg11: memref<128x8xf32, #tpu.memory_space<vmem>>, %arg12: memref<1x128xi32, #tpu.memory_space<vmem>>, %arg13: memref<4x8x8xf32, #tpu.memory_space<vmem>>, %arg14: memref<4x8x128xf32, #tpu.memory_space<vmem>>) attributes {dimension_semantics = [#tpu.dimension_semantics<parallel>], iteration_bounds = array<i64: 2>, scalar_prefetch = 0 : i64, scratch_operands = 0 : i64, tpu.core_type = #tpu.core_type<tc>, window_params = [{transform_indices = @transform_0, window_bounds = array<i64: 8, 16>}, {transform_indices = @transform_1, window_bounds = array<i64: 4, 8, 8>}, {transform_indices = @transform_2, window_bounds = array<i64: 4, 8, 128>}, {pipeline_mode = #tpu.pipeline_mode<synchronous>, transform_indices = @transform_3, window_bounds = array<i64: 16, 384>}, {pipeline_mode = #tpu.pipeline_mode<synchronous>, transform_indices = @transform_4, window_bounds = array<i64: 8, 384>}, {pipeline_mode = #tpu.pipeline_mode<synchronous>, transform_indices = @transform_5, window_bounds = array<i64: 1, 384>}, {pipeline_mode = #tpu.pipeline_mode<synchronous>, transform_indices = @transform_6, window_bounds = array<i64: 1, 384>}, {pipeline_mode = #tpu.pipeline_mode<synchronous>, transform_indices = @transform_7, window_bounds = array<i64: 8, 128>}, {pipeline_mode = #tpu.pipeline_mode<synchronous>, transform_indices = @transform_8, window_bounds = array<i64: 8, 128>}, {pipeline_mode = #tpu.pipeline_mode<synchronous>, transform_indices = @transform_9, window_bounds = array<i64: 128, 128>}, {pipeline_mode = #tpu.pipeline_mode<synchronous>, transform_indices = @transform_10, window_bounds = array<i64: 128, 8>}, {pipeline_mode = #tpu.pipeline_mode<synchronous>, transform_indices = @transform_11, window_bounds = array<i64: 1, 128>}, {transform_indices = @transform_12, window_bounds = array<i64: 4, 8, 8>}, {transform_indices = @transform_13, window_bounds = array<i64: 4, 8, 128>}]} {
    %c0 = arith.constant 0 : index
    %c0_0 = arith.constant 0 : index
    %0 = vector.load %arg1[%c0, %c0_0] : memref<8x16xf32, #tpu.memory_space<vmem>>, vector<8x16xf32>
    %c0_1 = arith.constant 0 : index
    %c0_2 = arith.constant 0 : index
    %c0_3 = arith.constant 0 : index
    %1 = vector.load %arg2[%c0_1, %c0_2, %c0_3] : memref<4x8x8xf32, #tpu.memory_space<vmem>>, vector<4x8x8xf32>
    %2 = vector.shape_cast %1 : vector<4x8x8xf32> to vector<32x8xf32>
    %c0_4 = arith.constant 0 : index
    %c0_5 = arith.constant 0 : index
    %3 = vector.load %arg4[%c0_4, %c0_5] : memref<16x384xf32, #tpu.memory_space<vmem>>, vector<16x384xf32>
    %cst = arith.constant dense<0.000000e+00> : vector<8x384xf32>
    %4 = tpu.matmul %0, %3, %cst {dimension_numbers = #tpu.dot_dimension_numbers<[1], [0], [0], [1], [0, 0, 1, 1], [], []>} : vector<8x16xf32>, vector<16x384xf32>, vector<8x384xf32> -> vector<8x384xf32>
    %c0_6 = arith.constant 0 : index
    %c0_7 = arith.constant 0 : index
    %5 = vector.load %arg6[%c0_6, %c0_7] : memref<1x384xf32, #tpu.memory_space<vmem>>, vector<1x384xf32>
    %6 = vector.broadcast %5 : vector<1x384xf32> to vector<8x384xf32>
    %7 = arith.addf %4, %6 : vector<8x384xf32>
    %c0_8 = arith.constant 0 : index
    %c0_9 = arith.constant 0 : index
    %8 = vector.load %arg5[%c0_8, %c0_9] : memref<8x384xf32, #tpu.memory_space<vmem>>, vector<8x384xf32>
    %cst_10 = arith.constant dense<0.000000e+00> : vector<32x384xf32>
    %9 = tpu.matmul %2, %8, %cst_10 {dimension_numbers = #tpu.dot_dimension_numbers<[1], [0], [0], [1], [0, 0, 1, 1], [], []>} : vector<32x8xf32>, vector<8x384xf32>, vector<32x384xf32> -> vector<32x384xf32>
    %c0_11 = arith.constant 0 : index
    %c0_12 = arith.constant 0 : index
    %10 = vector.load %arg7[%c0_11, %c0_12] : memref<1x384xf32, #tpu.memory_space<vmem>>, vector<1x384xf32>
    %11 = vector.broadcast %10 : vector<1x384xf32> to vector<32x384xf32>
    %12 = arith.addf %9, %11 : vector<32x384xf32>
    %13 = vector.extract_strided_slice %12 {offsets = [0, 0], sizes = [32, 128], strides = [1, 1]} : vector<32x384xf32> to vector<32x128xf32>
    %14 = vector.extract_strided_slice %7 {offsets = [0, 0], sizes = [8, 128], strides = [1, 1]} : vector<8x384xf32> to vector<8x128xf32>
    %15 = vector.shape_cast %13 : vector<32x128xf32> to vector<4x8x128xf32>
    %16 = vector.shape_cast %14 : vector<8x128xf32> to vector<1x8x128xf32>
    %17 = vector.broadcast %16 : vector<1x8x128xf32> to vector<4x8x128xf32>
    %18 = arith.addf %15, %17 : vector<4x8x128xf32>
    %19 = vector.shape_cast %18 : vector<4x8x128xf32> to vector<32x128xf32>
    %cst_13 = arith.constant 5.000000e-01 : f32
    %20 = vector.broadcast %cst_13 : f32 to vector<32x128xf32>
    %21 = arith.mulf %20, %19 : vector<32x128xf32>
    %22 = math.tanh %21 : vector<32x128xf32>
    %cst_14 = arith.constant 5.000000e-01 : f32
    %23 = vector.broadcast %cst_14 : f32 to vector<32x128xf32>
    %24 = arith.mulf %23, %22 : vector<32x128xf32>
    %cst_15 = arith.constant 5.000000e-01 : f32
    %25 = vector.broadcast %cst_15 : f32 to vector<32x128xf32>
    %26 = arith.addf %24, %25 : vector<32x128xf32>
    %27 = vector.extract_strided_slice %12 {offsets = [0, 128], sizes = [32, 128], strides = [1, 1]} : vector<32x384xf32> to vector<32x128xf32>
    %28 = vector.extract_strided_slice %7 {offsets = [0, 128], sizes = [8, 128], strides = [1, 1]} : vector<8x384xf32> to vector<8x128xf32>
    %29 = vector.shape_cast %27 : vector<32x128xf32> to vector<4x8x128xf32>
    %30 = vector.shape_cast %28 : vector<8x128xf32> to vector<1x8x128xf32>
    %31 = vector.broadcast %30 : vector<1x8x128xf32> to vector<4x8x128xf32>
    %32 = arith.addf %29, %31 : vector<4x8x128xf32>
    %33 = vector.shape_cast %32 : vector<4x8x128xf32> to vector<32x128xf32>
    %cst_16 = arith.constant 5.000000e-01 : f32
    %34 = vector.broadcast %cst_16 : f32 to vector<32x128xf32>
    %35 = arith.mulf %34, %33 : vector<32x128xf32>
    %36 = math.tanh %35 : vector<32x128xf32>
    %cst_17 = arith.constant 5.000000e-01 : f32
    %37 = vector.broadcast %cst_17 : f32 to vector<32x128xf32>
    %38 = arith.mulf %37, %36 : vector<32x128xf32>
    %cst_18 = arith.constant 5.000000e-01 : f32
    %39 = vector.broadcast %cst_18 : f32 to vector<32x128xf32>
    %40 = arith.addf %38, %39 : vector<32x128xf32>
    %41 = vector.extract_strided_slice %12 {offsets = [0, 256], sizes = [32, 128], strides = [1, 1]} : vector<32x384xf32> to vector<32x128xf32>
    %42 = arith.mulf %26, %41 : vector<32x128xf32>
    %43 = vector.extract_strided_slice %7 {offsets = [0, 256], sizes = [8, 128], strides = [1, 1]} : vector<8x384xf32> to vector<8x128xf32>
    %44 = vector.shape_cast %42 : vector<32x128xf32> to vector<4x8x128xf32>
    %45 = vector.shape_cast %43 : vector<8x128xf32> to vector<1x8x128xf32>
    %46 = vector.broadcast %45 : vector<1x8x128xf32> to vector<4x8x128xf32>
    %47 = arith.addf %44, %46 : vector<4x8x128xf32>
    %48 = vector.shape_cast %47 : vector<4x8x128xf32> to vector<32x128xf32>
    %49 = math.tanh %48 : vector<32x128xf32>
    %cst_19 = arith.constant 1.000000e+00 : f32
    %50 = vector.broadcast %cst_19 : f32 to vector<32x128xf32>
    %51 = arith.subf %50, %40 : vector<32x128xf32>
    %52 = arith.mulf %51, %49 : vector<32x128xf32>
    %c0_20 = arith.constant 0 : index
    %c0_21 = arith.constant 0 : index
    %53 = vector.load %arg9[%c0_20, %c0_21] : memref<8x128xf32, #tpu.memory_space<vmem>>, vector<8x128xf32>
    %cst_22 = arith.constant dense<0.000000e+00> : vector<32x128xf32>
    %54 = tpu.matmul %2, %53, %cst_22 {dimension_numbers = #tpu.dot_dimension_numbers<[1], [0], [0], [1], [0, 0, 1, 1], [], []>} : vector<32x8xf32>, vector<8x128xf32>, vector<32x128xf32> -> vector<32x128xf32>
    %55 = arith.mulf %40, %54 : vector<32x128xf32>
    %56 = arith.addf %52, %55 : vector<32x128xf32>
    %c0_23 = arith.constant 0 : index
    %c0_24 = arith.constant 0 : index
    %57 = vector.load %arg8[%c0_23, %c0_24] : memref<8x128xf32, #tpu.memory_space<vmem>>, vector<8x128xf32>
    %cst_25 = arith.constant dense<0.000000e+00> : vector<32x128xf32>
    %58 = tpu.matmul %2, %57, %cst_25 {dimension_numbers = #tpu.dot_dimension_numbers<[1], [0], [0], [1], [0, 0, 1, 1], [], []>} : vector<32x8xf32>, vector<8x128xf32>, vector<32x128xf32> -> vector<32x128xf32>
    %59 = arith.mulf %58, %56 : vector<32x128xf32>
    %c0_26 = arith.constant 0 : index
    %c0_27 = arith.constant 0 : index
    %60 = vector.load %arg10[%c0_26, %c0_27] : memref<128x128xf32, #tpu.memory_space<vmem>>, vector<128x128xf32>
    %cst_28 = arith.constant dense<0.000000e+00> : vector<32x128xf32>
    %61 = tpu.matmul %59, %60, %cst_28 {dimension_numbers = #tpu.dot_dimension_numbers<[1], [0], [0], [1], [0, 0, 1, 1], [], []>} : vector<32x128xf32>, vector<128x128xf32>, vector<32x128xf32> -> vector<32x128xf32>
    %62 = tpu.iota {dimensions = array<i32: 1>} : vector<32x128xi32>
    %c0_29 = arith.constant 0 : index
    %c0_30 = arith.constant 0 : index
    %c0_31 = arith.constant 0 : index
    %63 = vector.load %arg3[%c0_29, %c0_30, %c0_31] : memref<4x8x128xf32, #tpu.memory_space<vmem>>, vector<4x8x128xf32>
    %64 = vector.shape_cast %63 : vector<4x8x128xf32> to vector<32x128xf32>
    %65 = arith.addf %61, %64 : vector<32x128xf32>
    %c4_i32 = arith.constant 4 : i32
    %66 = vector.broadcast %c4_i32 : i32 to vector<32x128xi32>
    %67 = arith.cmpi slt, %62, %66 : vector<32x128xi32>
    %cst_32 = arith.constant 0xFF800000 : f32
    %68 = vector.broadcast %cst_32 : f32 to vector<32x128xf32>
    %69 = arith.select %67, %65, %68 : vector<32x128xi1>, vector<32x128xf32>
    %cst_33 = arith.constant dense<0xFF800000> : vector<32xf32>
    %70 = vector.multi_reduction <maximumf>, %69, %cst_33 [1] : vector<32x128xf32> to vector<32xf32>
    %71 = vector.shape_cast %70 : vector<32xf32> to vector<32x1xf32>
    %72 = vector.broadcast %71 : vector<32x1xf32> to vector<32x128xf32>
    %73 = arith.cmpf oge, %69, %72 : vector<32x128xf32>
    %c128_i32 = arith.constant 128 : i32
    %74 = vector.broadcast %c128_i32 : i32 to vector<32x128xi32>
    %75 = arith.select %73, %62, %74 : vector<32x128xi1>, vector<32x128xi32>
    %cst_34 = arith.constant dense<2147483647> : vector<32xi32>
    %76 = vector.multi_reduction <minsi>, %75, %cst_34 [1] : vector<32x128xi32> to vector<32xi32>
    %77 = vector.shape_cast %76 : vector<32xi32> to vector<32x1xi32>
    %78 = vector.broadcast %77 : vector<32x1xi32> to vector<32x128xi32>
    %79 = arith.cmpi eq, %62, %78 : vector<32x128xi32>
    %80 = arith.extui %79 : vector<32x128xi1> to vector<32x128xi32>
    %81 = arith.sitofp %80 : vector<32x128xi32> to vector<32x128xf32>
    %c0_35 = arith.constant 0 : index
    %c0_36 = arith.constant 0 : index
    %82 = vector.load %arg12[%c0_35, %c0_36] : memref<1x128xi32, #tpu.memory_space<vmem>>, vector<1x128xi32>
    %83 = vector.broadcast %82 : vector<1x128xi32> to vector<32x128xi32>
    %84 = vector.broadcast %77 : vector<32x1xi32> to vector<32x128xi32>
    %85 = arith.cmpi eq, %83, %84 : vector<32x128xi32>
    %86 = arith.extui %85 : vector<32x128xi1> to vector<32x128xi32>
    %87 = arith.sitofp %86 : vector<32x128xi32> to vector<32x128xf32>
    %c0_37 = arith.constant 0 : index
    %c0_38 = arith.constant 0 : index
    %88 = vector.load %arg11[%c0_37, %c0_38] : memref<128x8xf32, #tpu.memory_space<vmem>>, vector<128x8xf32>
    %89 = arith.mulf %87, %52 : vector<32x128xf32>
    %cst_39 = arith.constant dense<0.000000e+00> : vector<32x8xf32>
    %90 = tpu.matmul %89, %88, %cst_39 {dimension_numbers = #tpu.dot_dimension_numbers<[1], [0], [0], [1], [0, 0, 1, 1], [], []>} : vector<32x128xf32>, vector<128x8xf32>, vector<32x8xf32> -> vector<32x8xf32>
    %91 = arith.mulf %87, %40 : vector<32x128xf32>
    %cst_40 = arith.constant dense<0.000000e+00> : vector<32x8xf32>
    %92 = tpu.matmul %91, %88, %cst_40 {dimension_numbers = #tpu.dot_dimension_numbers<[1], [0], [0], [1], [0, 0, 1, 1], [], []>} : vector<32x128xf32>, vector<128x8xf32>, vector<32x8xf32> -> vector<32x8xf32>
    %93 = arith.mulf %92, %2 : vector<32x8xf32>
    %94 = arith.addf %90, %93 : vector<32x8xf32>
    %95 = vector.shape_cast %94 : vector<32x8xf32> to vector<4x8x8xf32>
    %c0_41 = arith.constant 0 : index
    %c0_42 = arith.constant 0 : index
    %c0_43 = arith.constant 0 : index
    %96 = vector.load %arg13[%c0_41, %c0_42, %c0_43] : memref<4x8x8xf32, #tpu.memory_space<vmem>>, vector<4x8x8xf32>
    tpu.vector_store %arg13[%c0_41, %c0_42, %c0_43], %95 {strides = array<i32>} : memref<4x8x8xf32, #tpu.memory_space<vmem>>, vector<4x8x8xf32>,
    %97 = vector.shape_cast %81 : vector<32x128xf32> to vector<4x8x128xf32>
    %c0_44 = arith.constant 0 : index
    %c0_45 = arith.constant 0 : index
    %c0_46 = arith.constant 0 : index
    %98 = vector.load %arg14[%c0_44, %c0_45, %c0_46] : memref<4x8x128xf32, #tpu.memory_space<vmem>>, vector<4x8x128xf32>
    tpu.vector_store %arg14[%c0_44, %c0_45, %c0_46], %97 {strides = array<i32>} : memref<4x8x128xf32, #tpu.memory_space<vmem>>, vector<4x8x128xf32>,
    return
  }
  func.func @transform_0(%arg0: i32) -> (i32, i32) {
    %c0_i32 = arith.constant 0 : i32
    %c0_i32_0 = arith.constant 0 : i32
    return %arg0, %c0_i32 : i32, i32
  }
  func.func @transform_1(%arg0: i32) -> (i32, i32, i32) {
    %c0_i32 = arith.constant 0 : i32
    %c0_i32_0 = arith.constant 0 : i32
    %c0_i32_1 = arith.constant 0 : i32
    return %c0_i32, %arg0, %c0_i32_0 : i32, i32, i32
  }
  func.func @transform_2(%arg0: i32) -> (i32, i32, i32) {
    %c0_i32 = arith.constant 0 : i32
    %c0_i32_0 = arith.constant 0 : i32
    %c0_i32_1 = arith.constant 0 : i32
    return %c0_i32, %arg0, %c0_i32_0 : i32, i32, i32
  }
  func.func @transform_3(%arg0: i32) -> (i32, i32) {
    %c0_i32 = arith.constant 0 : i32
    %c0_i32_0 = arith.constant 0 : i32
    %c0_i32_1 = arith.constant 0 : i32
    return %c0_i32, %c0_i32_0 : i32, i32
  }
  func.func @transform_4(%arg0: i32) -> (i32, i32) {
    %c0_i32 = arith.constant 0 : i32
    %c0_i32_0 = arith.constant 0 : i32
    %c0_i32_1 = arith.constant 0 : i32
    return %c0_i32, %c0_i32_0 : i32, i32
  }
  func.func @transform_5(%arg0: i32) -> (i32, i32) {
    %c0_i32 = arith.constant 0 : i32
    %c0_i32_0 = arith.constant 0 : i32
    %c0_i32_1 = arith.constant 0 : i32
    return %c0_i32, %c0_i32_0 : i32, i32
  }
  func.func @transform_6(%arg0: i32) -> (i32, i32) {
    %c0_i32 = arith.constant 0 : i32
    %c0_i32_0 = arith.constant 0 : i32
    %c0_i32_1 = arith.constant 0 : i32
    return %c0_i32, %c0_i32_0 : i32, i32
  }
  func.func @transform_7(%arg0: i32) -> (i32, i32) {
    %c0_i32 = arith.constant 0 : i32
    %c0_i32_0 = arith.constant 0 : i32
    %c0_i32_1 = arith.constant 0 : i32
    return %c0_i32, %c0_i32_0 : i32, i32
  }
  func.func @transform_8(%arg0: i32) -> (i32, i32) {
    %c0_i32 = arith.constant 0 : i32
    %c0_i32_0 = arith.constant 0 : i32
    %c0_i32_1 = arith.constant 0 : i32
    return %c0_i32, %c0_i32_0 : i32, i32
  }
  func.func @transform_9(%arg0: i32) -> (i32, i32) {
    %c0_i32 = arith.constant 0 : i32
    %c0_i32_0 = arith.constant 0 : i32
    %c0_i32_1 = arith.constant 0 : i32
    return %c0_i32, %c0_i32_0 : i32, i32
  }
  func.func @transform_10(%arg0: i32) -> (i32, i32) {
    %c0_i32 = arith.constant 0 : i32
    %c0_i32_0 = arith.constant 0 : i32
    %c0_i32_1 = arith.constant 0 : i32
    return %c0_i32, %c0_i32_0 : i32, i32
  }
  func.func @transform_11(%arg0: i32) -> (i32, i32) {
    %c0_i32 = arith.constant 0 : i32
    %c0_i32_0 = arith.constant 0 : i32
    %c0_i32_1 = arith.constant 0 : i32
    return %c0_i32, %c0_i32_0 : i32, i32
  }
  func.func @transform_12(%arg0: i32) -> (i32, i32, i32) {
    %c0_i32 = arith.constant 0 : i32
    %c0_i32_0 = arith.constant 0 : i32
    %c0_i32_1 = arith.constant 0 : i32
    return %c0_i32, %arg0, %c0_i32_0 : i32, i32, i32
  }
  func.func @transform_13(%arg0: i32) -> (i32, i32, i32) {
    %c0_i32 = arith.constant 0 : i32
    %c0_i32_0 = arith.constant 0 : i32
    %c0_i32_1 = arith.constant 0 : i32
    return %c0_i32, %arg0, %c0_i32_0 : i32, i32, i32
  }
}

</mosaic_0001>

<bundles_post_ra>
// kernel: _run.1
= control target key start
LH: loop header
LB: loop body
LE: loop exit
PB: predicated region body
PF: predicated region fallthrough
CT: control target
= control target key end

     0   :  { %s2833_s0 = inlined_call_operand.vmem [shape: f32[16,16], index: 0, kind: input, shape index: {}]   ;;  %s2834_s1 = inlined_call_operand.vmem [shape: f32[4,16,8], index: 1, kind: input, shape index: {}]   ;;  %s2835_s2 = inlined_call_operand.vmem [shape: f32[4,16,128], index: 2, kind: input, shape index: {}]   ;;  %s2836_s3 = inlined_call_operand.vmem [shape: f32[16,384], index: 3, kind: input, shape index: {}]   ;;  %s2837_s4 = inlined_call_operand.vmem [shape: f32[8,384], index: 4, kind: input, shape index: {}]   ;;  %s2838_s5 = inlined_call_operand.hbm [shape: f32[1,384], index: 5, kind: input, shape index: {}]   ;;  %s2839_s6 = inlined_call_operand.vmem [shape: f32[1,384], index: 6, kind: input, shape index: {}]   ;;  %s2840_s7 = inlined_call_operand.vmem [shape: f32[8,128], index: 7, kind: input, shape index: {}]   ;;  %s2841_s8 = inlined_call_operand.vmem [shape: f32[8,128], index: 8, kind: input, shape index: {}]   ;;  %s2842_s9 = inlined_call_operand.vmem [shape: f32[128,128], index: 9, kind: input, shape index: {}]   ;;  %s2843_s10 = inlined_call_operand.vmem [shape: f32[128,8], index: 10, kind: input, shape index: {}]   ;;  %s2844_s11 = inlined_call_operand.vmem [shape: s32[1,128], index: 11, kind: input, shape index: {}]   ;;  %s2845_s12 = inlined_call_operand.vmem [shape: f32[4,16,8], index: 12, kind: output, shape index: {0}]   ;;  %s2846_s13 = inlined_call_operand.vmem [shape: f32[4,16,128], index: 13, kind: output, shape index: {1}]  }
   0x1   :  { %2851 = sst [smem:[#allocation11_spill]] %s2834_s1 }
   0x2   :  { %2852 = sst [smem:[#allocation12_spill]] %s2835_s2 }
   0x3   :  { %19 = vsyncpa [#allocation5], 0  ;;  %s2426_s25 = smov 0   ;;  %s2428_s26 = smov 0  }
   0x4   :  { %s2430_s27 = smov 0  }
   0x5 LB: > { %s2442_s28 = sadd.s32 4294967295, %s2350_s27   ;;  %s2445_s29 = sadd.s32 1, %s2350_s27   ;;  %s2350_s27 = sphi %s2430_s27, %s2868_s27   ;;  %s2346_s26 = sphi %s2428_s26, %s2871_s26   ;;  %s2342_s25 = sphi %s2426_s25, %s2870_s25  }
   0x6   : > { %2853 = sst [smem:[#allocation9_spill]] %s2445_s29  ;;  %s55_s30 = ssub.s32 %s2350_s27, %s2445_s29 }
   0x7   : > { %s58_s14 = sadd.s32 1, %s2346_s26  ;;  %p56_p0 = scmp.eq.s32.totalorder %s55_s30, 0 }
   0x8   : > { %p65_p1 = scmp.ne.s32.totalorder %s2346_s26, %s2342_s25  ;;  %p66_p2 = scmp.eq.s32.totalorder %s2350_s27, 0 }
   0x9   : > { %p310_p3 = scmp.eq.s32.totalorder %s2442_s28, 1  ;;  %p1861_p6 = scmp.ge.s32.totalorder %s2350_s27, 1 }
   0xa   : > { %s2455_s15 = scalar_select %p56_p0, %s2346_s26, %s58_s14  }
   0xb   : > { %p2457_p4 = por %p66_p2, %p65_p1  ;;  %p2461_p5 = por %p310_p3, %p65_p1 }
   0xc   : > { %2854 = sst [smem:[#allocation10_spill]] %s2455_s15  ;;  %p349_p7 = scmp.lt.s32.totalorder %s2350_s27, 3 }
   0xd   : > { %s2855_s16 = scalar_select %p2457_p4, 1, 0 }
   0xe   : > { %s2856_s17 = scalar_select %p2461_p5, 1, 0 }
   0xf   : > { %p2849_p8 = scmp.eq.s32.totalorder %s2442_s28, 0  ;;  %p2468_p9 = pnand %p1861_p6, %p349_p7 }
  0x10   : > { %s2352_s19 = smov [#allocation4]   ;;  %s2296_s24 = scalar_lea.hbm %s2838_s5, 48 }
  0x11   : > { %s2857_s18 = scalar_select %p2468_p9, 1, 0 }
  0x12   : > { %s368_s20 = sshll.u32 %s2352_s19, 4  ;;  %p2238_p10 = pneg %p2468_p9  ;;  %s369_s20 = int_to_ptr.vmem [resolvable:$true] %s368_s20 }
  0x13   : > { %p2297_p12 = scmp.ne.s32.totalorder %s2838_s5, %s2296_s24  ;;  %p2303_p2 = scmp.lt.u32.totalorder %s2296_s24, %s2838_s5 }
  0x14   : > { %p2476_p11 = pnand %p2849_p8, %p2238_p10 }
  0x16   : > { %p2298_p13 = pneg %p2476_p11 }
  0x18   : > { %p2299_p0 = pnand %p2298_p13, %p2297_p12 }
  0x1a   : > { %p2300_p1 = pneg %p2299_p0 }
  0x1c   : > { %p2305_p3 = pnand %p2303_p2, %p2300_p1 }
  0x1e   : > { %2308 = shalt.err (!%p2305_p3)
}
  0x1f   : > { %s2309_s29 = scalar_lea.vmem %s369_s20, 48  ;;  %s2316_s22 = scalar_lea.vmem %s369_s20, 64 }
  0x20   : > { %p2310_p6 = scmp.ne.s32.totalorder %s369_s20, %s2309_s29  ;;  %p2317_p8 = scmp.lt.s32.totalorder %s369_s20, %s369_s20 }
  0x21   : > { %p2318_p5 = scmp.lt.s32.totalorder %s2316_s22, %s2309_s29 }
  0x22   : > { %p2312_p7 = pnand %p2310_p6, %p2298_p13 }
  0x23   : > { %p2319_p9 = por %p2318_p5, %p2317_p8 }
  0x24   : > { %p2313_p10 = pneg %p2312_p7 }
  0x26   : > { %p2320_p4 = pnand %p2319_p9, %p2313_p10 }
  0x28   : > { %2323 = shalt.err (!%p2320_p4)
}
  0x29   : > { %2241 = dma.hbm_to_vmem [thread:$0]  (!%p2476_p11), %s2838_s5, 48, %s369_s20, [#allocation5]  }
  0x2a   : > { %p1863_p12 = scmp.ge.s32.totalorder %s2350_s27, 2 }
  0x2b   : > { %p2859_p0 = scmp.ne.s32.totalorder (!%p1863_p12), %s2855_s16, 0 }
  0x2c   : > { %393 = sbr.rel (%p1863_p12) target bundleno = 76 (0x4c), region = 52 }
  0x33   : > { %403 = sbr.rel (!%p2859_p0) target bundleno = 63 (0x3f), region = 60  ;;  %s405_s15 = sand.u32 (%p2859_p0), 1, %s2346_s26  }
  0x34   : > { %s1865_s24 = sshll.u32 (%p2859_p0), %s2350_s27, 3  ;;  %s1864_s29 = sshll.u32 (%p2859_p0), %s405_s15, 5 }
  0x35   : > { %s2860_s1 = sld [smem:[#allocation11_spill]] (%p2859_p0)  ;;  %s407_s21 = scalar_lea.vmem (%p2859_p0), [#allocation2], %s1864_s29 }
  0x3b   : > { %s409_s22 = scalar_lea.vmem %s2860_s1, %s1865_s24 }
  0x3c   : > { %v443_v0 = vld [vmem:[%s409_s22] sm:$0xff]  ;;  %v445_v1 = vld [vmem:[%s409_s22 + $0x10] sm:$0xff] }
  0x3d   : > { %v447_v2 = vld [vmem:[%s409_s22 + $0x20] sm:$0xff]  ;;  %444 = vst [vmem:[%s407_s21] sm:$0xff] %v443_v0  ;;  %446 = vst [vmem:[%s407_s21 + $0x8] sm:$0xff] %v445_v1  ;;  %v449_v3 = vld [vmem:[%s409_s22 + $0x30] sm:$0xff] }
  0x3e   : > { %448 = vst [vmem:[%s407_s21 + $0x10] sm:$0xff] %v447_v2  ;;  %450 = vst [vmem:[%s407_s21 + $0x18] sm:$0xff] %v449_v3 }
  0x3f PF: > { %p2861_p4 = scmp.ne.s32.totalorder %s2855_s16, 0 }
  0x40   : > { %s458_s20 = sand.u32 (%p2861_p4), 1, %s2346_s26   ;;  %s1867_s23 = sshll.u32 (%p2861_p4), %s2350_s27, 3 }
  0x41   : > { %456 = sbr.rel (!%p2861_p4) target bundleno = 76 (0x4c), region = 98  ;;  %s1866_s30 = sshll.u32 (%p2861_p4), %s458_s20, 5 }
  0x42   : > { %s2862_s2 = sld [smem:[#allocation12_spill]] (%p2861_p4)  ;;  %s460_s29 = scalar_lea.vmem (%p2861_p4), [#allocation3], %s1866_s30 }
  0x48   : > { %s462_s14 = scalar_lea.vmem %s2862_s2, %s1867_s23 }
  0x49   : > { %v496_v4 = vld [vmem:[%s462_s14] sm:$0xff]  ;;  %v498_v5 = vld [vmem:[%s462_s14 + $0x10] sm:$0xff] }
  0x4a   : > { %v500_v6 = vld [vmem:[%s462_s14 + $0x20] sm:$0xff]  ;;  %497 = vst [vmem:[%s460_s29] sm:$0xff] %v496_v4  ;;  %499 = vst [vmem:[%s460_s29 + $0x8] sm:$0xff] %v498_v5  ;;  %v502_v7 = vld [vmem:[%s462_s14 + $0x30] sm:$0xff] }
  0x4b   : > { %501 = vst [vmem:[%s460_s29 + $0x10] sm:$0xff] %v500_v6  ;;  %503 = vst [vmem:[%s460_s29 + $0x18] sm:$0xff] %v502_v7 }
  0x4c PF: > { %p2863_p5 = scmp.ne.s32.totalorder %s2857_s18, 0 }
  0x4d   : > { %s515_s27 = sand.u32 (!%p2863_p5), 1, %s2342_s25   ;;  %p2864_p8 = scmp.eq.s32.totalorder (!%p2863_p5), %s2442_s28, 0 }
  0x4e   : > { %512 = sbr.rel (%p2863_p5) target bundleno = 1264 (0x4f0), region = 136  ;;  %s2514_s16 = sshll.u32 (!%p2863_p5), %s515_s27, 5 }
  0x4f   : > { %s2517_s19 = scalar_lea.vmem (!%p2863_p5), [#allocation2], %s2514_s16  ;;  %s2520_s22 = scalar_lea.vmem (!%p2863_p5), [#allocation3], %s2514_s16 }
  0x55   : > { %2337 = dma.done.wait (%p2864_p8), [#allocation5], 48   ;;  %p2865_p9 = pmov %p2864_p8 }
  0x56   : > { %p580_p11 = scmp.lt.s32.totalorder %s2442_s28, 1  ;;  %v2353_v8 = vmov 0.0   ;;  %v590_v9 = vld [vmem:[%s2836_s3 + $0x8] sm:$0xff]  ;;  %v593_v10 = vld [vmem:[%s2836_s3 + $0x20] sm:$0xff]  ;;  %v592_v13 = vld [vmem:[%s2836_s3 + $0x18] sm:$0xff]  ;;  %vm777_vm0 = vcmask 64512   ;;  %v597_v53 = vlaneseq }
  0x57   : > { %2339 = vsyncadd (%p2865_p9), [#allocation5], 4294967248  ;;  %680 = vmatprep.mubr.f32.mxu0 %v2353_v8  ;;  %v589_v11 = vld [vmem:[%s2836_s3] sm:$0xff]  ;;  %v2131_v12 = vpack.c.bf16 %v593_v10, %v590_v9  ;;  %v591_v14 = vld [vmem:[%s2836_s3 + $0x10] sm:$0xff]  ;;  %vm612_vm1 = vcmask 130048   ;;  %v2354_v21 = vmov 0.0|0.0  }
  0x58   : > { %s581_s25 = scalar_select %p580_p11, %s2442_s28, 1  ;;  %v2133_v15 = vpack.c.bf16 %v592_v13, %v589_v11  ;;  %v594_v16 = vld [vmem:[%s2836_s3 + $0x28] sm:$0xff]  ;;  %v2551_v17 = vld [vmem:[%s2517_s19] sm:$0xff]  ;;  %vm2355_vm2 = vmmov 0   ;;  %v2569_v24 = vld [vmem:[%s2517_s19 + $0x10] sm:$0xff]  ;;  %v598_v54 = vshrl.u32 %v597_v53, 7 }
  0x59   : > { %2132 = vmatprep.subr.bf16.mxu0 %v2131_v12  ;;  %v2136_v19 = vpack.c.bf16 %v594_v16, %v591_v14  ;;  %v1024_v20 = vld [vmem:[%s2841_s8] sm:$0xff]  ;;  %2003 = vmatprep.mubr.msk.f32.mxu1 %vm777_vm0, %v2551_v17  ;;  %v758_v22 = vld [vmem:[%s2837_s4 + $0x8] sm:$0xff]  ;;  %v759_v26 = vld [vmem:[%s2837_s4 + $0x10] sm:$0xff]  ;;  %s2775_s24 = scalar_lea.vmem [#allocation7], %s2514_s16  ;;  %s573_s14 = scalar_lea.vmem [#allocation6], %s2514_s16 }
  0x5a   : > { %s1874_s18 = sshll.u32 %s581_s25, 3  ;;  %2134 = vmatpush1.bf16.msra.mxu0 %v2133_v15  ;;  %2001 = vmatprep.subr.mxu1 %v1024_v20  ;;  %v2562_v23 = vld [vmem:[%s2517_s19 + $0x8] sm:$0xff]  ;;  %v757_v25 = vld [vmem:[%s2837_s4] sm:$0xff]  ;;  %v2580_v27 = vld [vmem:[%s2517_s19 + $0x18] sm:$0xff]  ;;  %v599_v57 = vsub.s32 0, %v598_v54  ;;  %v603_v62 = vsub.s32 1, %v598_v54 }
  0x5b   : > { %s583_s25 = scalar_lea.vmem %s2833_s0, %s1874_s18  ;;  %2135 = vmatprep.subr.bf16.mxu0 %v2354_v21  ;;  %2002 = vmatpush3.msra.mxu1 %v1024_v20  ;;  %v1118_v28 = vld [vmem:[%s2840_s7] sm:$0xff]  ;;  %v1209_v30 = vld [vmem:[%s2842_s9 + $0x8] sm:$0xff]  ;;  %v1210_v32 = vld [vmem:[%s2842_s9 + $0x10] sm:$0xff]  ;;  %p2866_p13 = scmp.ne.s32.totalorder %s2856_s17, 0 }
  0x5c   : > { %v584_v18 = vld [vmem:[%s583_s25] sm:$0xff]  ;;  %2004 = vmatmul.mubr.msk.f32.vlgmr.msra.gmra.mrb[0].mxu1 %vm777_vm0, %v2562_v23  ;;  %v1211_v33 = vld [vmem:[%s2842_s9 + $0x18] sm:$0xff]  ;;  %v1213_v36 = vld [vmem:[%s2842_s9 + $0x28] sm:$0xff]  ;;  %s1904_s16 = sshll.u32 (%p2866_p13), %s2442_s28, 3 }
  0x5d   : > { %1875 = vmatmul.mubr.msk.f32.vlgmr.msra.gmra.mrb[0].mxu0 %vm612_vm1, %v584_v18  ;;  %2006 = vmatprep.mubr.msk.f32.mxu1 %vm777_vm0, %v2569_v24  ;;  %v1208_v29 = vld [vmem:[%s2842_s9] sm:$0xff]  ;;  %v2142_v34 = vpack.c.bf16 %v1211_v33, %v1210_v32  ;;  %v1214_v38 = vld [vmem:[%s2842_s9 + $0x30] sm:$0xff]  ;;  %v1215_v39 = vld [vmem:[%s2842_s9 + $0x38] sm:$0xff]  ;;  %s1639_s25 = scalar_lea.vmem (%p2866_p13), %s2845_s12, %s1904_s16 }
  0x5e   : > { %2137 = vmatpush3.bf16.msra.mxu0 %v2136_v19  ;;  %1990 = vmatprep.mubr.msk.f32.mxu0 %vm2355_vm2, %v2353_v8  ;;  %v2138_v31 = vpack.c.bf16 %v1209_v30, %v1208_v29  ;;  %v1212_v35 = vld [vmem:[%s2842_s9 + $0x20] sm:$0xff]  ;;  %v2150_v40 = vpack.c.bf16 %v1215_v39, %v1214_v38  ;;  %v1217_v42 = vld [vmem:[%s2842_s9 + $0x48] sm:$0xff]  ;;  %v1218_v44 = vld [vmem:[%s2842_s9 + $0x50] sm:$0xff] }
  0x5f   : > { %790 = vmatprep.subr.mxu0 %v758_v22  ;;  %v2146_v37 = vpack.c.bf16 %v1213_v36, %v1212_v35  ;;  %v1216_v41 = vld [vmem:[%s2842_s9 + $0x40] sm:$0xff]  ;;  %v1219_v45 = vld [vmem:[%s2842_s9 + $0x58] sm:$0xff]  ;;  %v1221_v48 = vld [vmem:[%s2842_s9 + $0x68] sm:$0xff] }
  0x60   : > { %2007 = vmatmul.mubr.msk.f32.gmra.mrb[2].mxu1 %vm777_vm0, %v2580_v27  ;;  %2139 = vmatprep.subr.bf16.mxu1 %v2138_v31  ;;  %v2154_v43 = vpack.c.bf16 %v1217_v42, %v1216_v41  ;;  %v2158_v46 = vpack.c.bf16 %v1219_v45, %v1218_v44  ;;  %v1220_v47 = vld [vmem:[%s2842_s9 + $0x60] sm:$0xff]  ;;  %v1222_v50 = vld [vmem:[%s2842_s9 + $0x70] sm:$0xff]  ;;  %v1223_v51 = vld [vmem:[%s2842_s9 + $0x78] sm:$0xff] }
  0x61   : > { %1991 = vmatmul.mubr.msk.f32.vlgmr.msra.gmra.mrb[2].mxu0 %vm612_vm1, %v584_v18  ;;  %2141 = vmatpush3.bf16.msra.mxu1 %v2138_v31  ;;  %v2162_v49 = vpack.c.bf16 %v1221_v48, %v1220_v47  ;;  %v2166_v52 = vpack.c.bf16 %v1223_v51, %v1222_v50  ;;  %v595_v60 = vld [vmem:[#allocation4] sm:$0x7] }
  0x62   : > { %791 = vmatpush1.msra.mxu0 %v757_v25  ;;  %854 = vmatprep.mubr.f32.mxu0 %v2353_v8  ;;  %v760_v61 = vld [vmem:[%s2839_s6] sm:$0x7]  ;;  %v600_v1 = vrot.slane %v595_v60, %v599_v57  ;;  %v604_v5 = vrot.slane %v595_v60, %v603_v62 }
  0x63   : > { %1993 = vmatprep.subr.mxu0 %v759_v26  ;;  %2143 = vmatprep.subr.bf16.mxu1 %v2142_v34  ;;  %v765_v2 = vrot.slane %v760_v61, %v599_v57  ;;  %v769_v6 = vrot.slane %v760_v61, %v603_v62 }
  0x65   : > { %1877 = vmatmul.mubr.msk.f32.vlgmr.msra.gmra.mrb[4].mxu0 %vm777_vm0, %v2551_v17  ;;  %2145 = vmatpush3.bf16.msra.mxu1 %v2142_v34  ;;  %v607_v34 = vsub.s32 2, %v598_v54 }
  0x66   : > { %860 = vmatprep.mubr.f32.mxu0 %v2353_v8  ;;  %1994 = vmatpush3.msra.mxu0 %v759_v26 }
  0x67   : > { %2009 = vmatprep.subr.mxu0 %v1118_v28  ;;  %2147 = vmatprep.subr.bf16.mxu1 %v2146_v37  ;;  %v608_v47 = vrot.slane %v595_v60, %v607_v34 }
  0x69   : > { %1878 = vmatmul.mubr.msk.f32.gmra.mrb[6].mxu0 %vm777_vm0, %v2562_v23  ;;  %2149 = vmatpush3.bf16.msra.mxu1 %v2146_v37 }
  0x6a   : > { %866 = vmatprep.mubr.f32.mxu0 %v2353_v8  ;;  %2151 = vmatprep.subr.bf16.mxu1 %v2150_v40 }
  0x6d   : > { %1879 = vmatmul.mubr.msk.f32.gmra.mrb[8].mxu0 %vm777_vm0, %v2569_v24  ;;  %2153 = vmatpush3.bf16.msra.mxu1 %v2150_v40  ;;  %v773_v40 = vrot.slane %v760_v61, %v607_v34 }
  0x6e   : > { %872 = vmatprep.mubr.f32.mxu0 %v2353_v8  ;;  %2155 = vmatprep.subr.bf16.mxu1 %v2154_v43 }
  0x71   : > { %1880 = vmatmul.mubr.msk.f32.gmra.mrb[10].mxu0 %vm777_vm0, %v2580_v27  ;;  %2157 = vmatpush3.bf16.msra.mxu1 %v2154_v43 }
  0x72   : > { %1995 = vmatprep.mubr.msk.f32.mxu0 %vm777_vm0, %v2551_v17  ;;  %2159 = vmatprep.subr.bf16.mxu1 %v2158_v46 }
  0x75   : > { %1996 = vmatmul.mubr.msk.f32.vlgmr.msra.gmra.mrb[12].mxu0 %vm777_vm0, %v2562_v23  ;;  %2161 = vmatpush3.bf16.msra.mxu1 %v2158_v46 }
  0x76   : > { %1998 = vmatprep.mubr.msk.f32.mxu0 %vm777_vm0, %v2569_v24  ;;  %2010 = vmatpush3.msra.mxu0 %v1118_v28 }
  0x77   : > { %2163 = vmatprep.subr.bf16.mxu1 %v2162_v49 }
  0x79   : > { %1999 = vmatmul.mubr.msk.f32.gmra.mrb[14].mxu0 %vm777_vm0, %v2580_v27  ;;  %2165 = vmatpush3.bf16.msra.mxu1 %v2162_v49 }
  0x7a   : > { %2011 = vmatprep.mubr.msk.f32.mxu0 %vm777_vm0, %v2551_v17  ;;  %2167 = vmatprep.subr.bf16.mxu1 %v2166_v52 }
  0x7d   : > { %2012 = vmatmul.mubr.msk.f32.vlgmr.msra.gmra.mrb[16].mxu0 %vm777_vm0, %v2562_v23  ;;  %2169 = vmatpush3.bf16.msra.mxu1 %v2166_v52 }
  0x7e   : > { %2014 = vmatprep.mubr.msk.f32.mxu0 %vm777_vm0, %v2569_v24 }
  0x81   : > { %2015 = vmatmul.mubr.msk.f32.gmra.mrb[18].mxu0 %vm777_vm0, %v2580_v27 }
 0x12f   : > { %v2665_v56 = vpop.f32.mrb[0].mxu1 }
 0x130   : > { %v682_v55 = vpop.f32.mrb[0].mxu0  ;;  %v2667_v59 = vpop.f32.mrb[1].mxu1 }
 0x131   : > { %v684_v58 = vpop.f32.mrb[1].mxu0  ;;  %v683_v9 = vadd.f32 %v682_v55, %v600_v1 }
 0x132   : > { %v685_v12 = vadd.f32 %v684_v58, %v604_v5 }
 0x133   : > { %v2672_v0 = vpop.f32.mrb[2].mxu1 }
 0x134   : > { %v753_v63 = vpop.f32.mrb[2].mxu0  ;;  %v2674_v4 = vpop.f32.mrb[3].mxu1 }
 0x135   : > { %v1992_v3 = vpop.f32.mrb[3].mxu0  ;;  %v754_v58 = vadd.f32 %v753_v63, %v608_v47 }
 0x138   : > { %v856_v7 = vpop.f32.mrb[4].mxu0 }
 0x139   : > { %v857_v10 = vadd.f32 %v856_v7, %v765_v2  ;;  %v858_v11 = vpop.f32.mrb[5].mxu0 }
 0x13a   : > { %v859_v13 = vadd.f32 %v858_v11, %v769_v6 }
 0x13b   : > { %v964_v14 = vadd.f32 %v857_v10, %v683_v9 }
 0x13c   : > { %v984_v15 = vadd.f32 %v859_v13, %v685_v12  ;;  %v862_v16 = vpop.f32.mrb[6].mxu0 }
 0x13d   : > { %v968_v18 = vmul.f32 0.5, %v964_v14  ;;  %v863_v19 = vadd.f32 %v862_v16, %v765_v2  ;;  %v864_v20 = vpop.f32.mrb[7].mxu0 }
 0x13e   : > { %v865_v21 = vadd.f32 %v864_v20, %v769_v6  ;;  %v988_v31 = vmul.f32 0.5, %v984_v15 }
 0x13f   : > { %2272 = vtanh.f32 %v968_v18  ;;  %v965_v22 = vadd.f32 %v863_v19, %v683_v9 }
 0x140   : > { %v985_v25 = vadd.f32 %v865_v21, %v685_v12  ;;  %v868_v26 = vpop.f32.mrb[8].mxu0 }
 0x141   : > { %v969_v28 = vmul.f32 0.5, %v965_v22  ;;  %v869_v29 = vadd.f32 %v868_v26, %v765_v2  ;;  %v870_v30 = vpop.f32.mrb[9].mxu0 }
 0x142   : > { %v871_v32 = vadd.f32 %v870_v30, %v769_v6  ;;  %v989_v41 = vmul.f32 0.5, %v985_v25 }
 0x143   : > { %2274 = vtanh.f32 %v969_v28  ;;  %v966_v33 = vadd.f32 %v869_v29, %v683_v9 }
 0x144   : > { %v986_v35 = vadd.f32 %v871_v32, %v685_v12  ;;  %v874_v36 = vpop.f32.mrb[10].mxu0  ;;  %2276 = vtanh.f32 %v988_v31 }
 0x145   : > { %v970_v37 = vmul.f32 0.5, %v966_v33  ;;  %v875_v38 = vadd.f32 %v874_v36, %v765_v2  ;;  %v876_v39 = vpop.f32.mrb[11].mxu0 }
 0x146   : > { %v877_v42 = vadd.f32 %v876_v39, %v769_v6  ;;  %v990_v50 = vmul.f32 0.5, %v986_v35 }
 0x147   : > { %2278 = vtanh.f32 %v970_v37  ;;  %v967_v43 = vadd.f32 %v875_v38, %v683_v9 }
 0x148   : > { %v987_v44 = vadd.f32 %v877_v42, %v685_v12  ;;  %v1997_v45 = vpop.f32.mrb[12].mxu0  ;;  %2280 = vtanh.f32 %v989_v41 }
 0x149   : > { %v2273_v46 = vpop.eup %2272  ;;  %v971_v48 = vmul.f32 0.5, %v967_v43  ;;  %v945_v49 = vpop.f32.mrb[13].mxu0  ;;  %v951_v1 = vadd.f32 %v1997_v45, %v773_v40 }
 0x14a   : > { %v946_v51 = vadd.f32 %v945_v49, %v773_v40  ;;  %v976_v52 = vmul.f32 0.5, %v2273_v46  ;;  %v991_v61 = vmul.f32 0.5, %v987_v44 }
 0x14b   : > { %2282 = vtanh.f32 %v971_v48 }
 0x14c   : > { %v980_v54 = vadd.f32 0.5, %v976_v52  ;;  %v2000_v55 = vpop.f32.mrb[14].mxu0  ;;  %2284 = vtanh.f32 %v990_v50 }
 0x14d   : > { %v2275_v57 = vpop.eup %2274  ;;  %v955_v62 = vpop.f32.mrb[15].mxu0  ;;  %2286 = vtanh.f32 %v991_v61  ;;  %v961_v29 = vadd.f32 %v2000_v55, %v773_v40 }
 0x14e   : > { %v977_v2 = vmul.f32 0.5, %v2275_v57  ;;  %v1004_v3 = vmul.f32 %v980_v54, %v946_v51  ;;  %v2277_v5 = vpop.eup %2276  ;;  %v956_v12 = vadd.f32 %v955_v62, %v773_v40 }
 0x14f   : > { %v996_v14 = vmul.f32 0.5, %v2277_v5  ;;  %v1226_v5 = vld [vmem:[%s2520_s22] sm:$0xff] }
 0x150   : > { %v981_v6 = vadd.f32 0.5, %v977_v2  ;;  %v1008_v60 = vadd.f32 %v1004_v3, %v754_v58  ;;  %v2013_v7 = vpop.f32.mrb[16].mxu0  ;;  %v2709_v3 = vand.u32 127, %v597_v53 }
 0x151   : > { %v2279_v9 = vpop.eup %2278  ;;  %v1185_v10 = vpop.f32.mrb[17].mxu0  ;;  %v2676_v26 = vadd.f32 0.5, %v996_v14  ;;  %v1229_v14 = vld [vmem:[%s2520_s22 + $0x18] sm:$0xff] }
 0x152   : > { %v1005_v11 = vmul.f32 %v981_v6, %v951_v1  ;;  %2288 = vtanh.f32 %v1008_v60  ;;  %v978_v13 = vmul.f32 0.5, %v2279_v9  ;;  %v2281_v15 = vpop.eup %2280  ;;  %v1227_v60 = vld [vmem:[%s2520_s22 + $0x8] sm:$0xff]  ;;  %vm1315_vm3 = vcmp.lt.s32.totalorder %v2709_v3, 4 }
 0x153   : > { %v997_v25 = vmul.f32 0.5, %v2281_v15  ;;  %v1016_v36 = vsub.f32 1.0, %v2676_v26  ;;  %v1110_v39 = vmul.f32 %v2667_v59, %v2676_v26 }
 0x154   : > { %v1009_v63 = vadd.f32 %v1005_v11, %v754_v58  ;;  %v982_v16 = vadd.f32 0.5, %v978_v13  ;;  %v2016_v18 = vpop.f32.mrb[18].mxu0  ;;  %v1228_v11 = vld [vmem:[%s2520_s22 + $0x10] sm:$0xff] }
 0x155   : > { %v2283_v19 = vpop.eup %2282  ;;  %v1195_v20 = vpop.f32.mrb[19].mxu0  ;;  %v2678_v34 = vadd.f32 0.5, %v997_v25 }
 0x156   : > { %2290 = vtanh.f32 %v1009_v63  ;;  %v979_v21 = vmul.f32 0.5, %v2283_v19  ;;  %v1006_v22 = vmul.f32 %v982_v16, %v956_v12  ;;  %v2285_v28 = vpop.eup %2284 }
 0x157   : > { %v2287_v33 = vpop.eup %2286  ;;  %v998_v35 = vmul.f32 0.5, %v2285_v28  ;;  %v1017_v43 = vsub.f32 1.0, %v2678_v34  ;;  %v1111_v46 = vmul.f32 %v2665_v56, %v2678_v34 }
 0x158   : > { %v983_v30 = vadd.f32 0.5, %v979_v21  ;;  %v1010_v31 = vadd.f32 %v1006_v22, %v754_v58  ;;  %v999_v42 = vmul.f32 0.5, %v2287_v33 }
 0x159   : > { %v2685_v40 = vadd.f32 0.5, %v998_v35 }
 0x15a   : > { %v1007_v32 = vmul.f32 %v983_v30, %v961_v29  ;;  %2292 = vtanh.f32 %v1010_v31  ;;  %v2693_v49 = vadd.f32 0.5, %v999_v42  ;;  %v1421_v42 = vld [vmem:[%s2843_s10] sm:$0xff] }
 0x15b   : > { %v1018_v50 = vsub.f32 1.0, %v2685_v40  ;;  %v1112_v52 = vmul.f32 %v2674_v4, %v2685_v40 }
 0x15c   : > { %v2289_v37 = vpop.eup %2288  ;;  %v1011_v38 = vadd.f32 %v1007_v32, %v754_v58  ;;  %v1019_v56 = vsub.f32 1.0, %v2693_v49  ;;  %v1113_v61 = vmul.f32 %v2672_v0, %v2693_v49 }
 0x15d   : > { %v2683_v41 = vmul.f32 %v2289_v37, %v1016_v36 }
 0x15e   : > { %2294 = vtanh.f32 %v1011_v38 }
 0x15f   : > { %v1114_v44 = vadd.f32 %v1110_v39, %v2683_v41 }
 0x160   : > { %v2291_v45 = vpop.eup %2290 }
 0x161   : > { %v2691_v47 = vmul.f32 %v2291_v45, %v1017_v43  ;;  %v1204_v48 = vmul.f32 %v1185_v10, %v1114_v44  ;;  %v1422_v43 = vld [vmem:[%s2843_s10 + $0x8] sm:$0xff]  ;;  %v1423_v44 = vld [vmem:[%s2843_s10 + $0x10] sm:$0xff] }
 0x162   : > { %v2170_v45 = vpack.c.bf16 %v1422_v43, %v1421_v42 }
 0x163   : > { %v1115_v59 = vadd.f32 %v1111_v46, %v2691_v47  ;;  %2049 = vmatprep.mubr.f32.mxu1 %v1204_v48  ;;  %v1424_v46 = vld [vmem:[%s2843_s10 + $0x18] sm:$0xff] }
 0x164   : > { %v2293_v51 = vpop.eup %2292  ;;  %v2174_v48 = vpack.c.bf16 %v1424_v46, %v1423_v44  ;;  %2171 = vmatprep.subr.bf16.mxu0 %v2170_v45  ;;  %2203 = vmatprep.subr.bf16.mxu1 %v2170_v45 }
 0x165   : > { %v1205_v54 = vmul.f32 %v2013_v7, %v1115_v59  ;;  %v2699_v55 = vmul.f32 %v2293_v51, %v1018_v50  ;;  %v1425_v59 = vld [vmem:[%s2843_s10 + $0x20] sm:$0xff]  ;;  %v1426_v50 = vld [vmem:[%s2843_s10 + $0x28] sm:$0xff]  ;;  %2173 = vmatpush3.bf16.msra.mxu0 %v2170_v45 }
 0x166   : > { %2175 = vmatprep.subr.bf16.mxu0 %v2174_v48  ;;  %v2178_v51 = vpack.c.bf16 %v1426_v50, %v1425_v59 }
 0x167   : > { %2050 = vmatmul.mubr.f32.vlgmr.msra.gmra.mrb[4].mxu1 %v1205_v54  ;;  %v1116_v57 = vadd.f32 %v1112_v52, %v2699_v55  ;;  %v1427_v52 = vld [vmem:[%s2843_s10 + $0x30] sm:$0xff]  ;;  %v1428_v54 = vld [vmem:[%s2843_s10 + $0x38] sm:$0xff] }
 0x168   : > { %v2295_v58 = vpop.eup %2294  ;;  %2205 = vmatpush3.bf16.msra.mxu1 %v2170_v45 }
 0x169   : > { %v2705_v62 = vmul.f32 %v2295_v58, %v1019_v56  ;;  %v1206_v1 = vmul.f32 %v1195_v20, %v1116_v57  ;;  %2207 = vmatprep.subr.bf16.mxu1 %v2174_v48  ;;  %2177 = vmatpush3.bf16.msra.mxu0 %v2174_v48  ;;  %v2182_v56 = vpack.c.bf16 %v1428_v54, %v1427_v52  ;;  %v1429_v57 = vld [vmem:[%s2843_s10 + $0x40] sm:$0xff]  ;;  %v1430_v58 = vld [vmem:[%s2843_s10 + $0x48] sm:$0xff] }
 0x16a   : > { %2179 = vmatprep.subr.bf16.mxu0 %v2178_v51 }
 0x16b   : > { %v1117_v2 = vadd.f32 %v1113_v61, %v2705_v62  ;;  %2052 = vmatprep.mubr.f32.mxu1 %v1206_v1  ;;  %v2186_v61 = vpack.c.bf16 %v1430_v58, %v1429_v57 }
 0x16c   : > { %2209 = vmatpush3.bf16.msra.mxu1 %v2174_v48 }
 0x16d   : > { %v1207_v4 = vmul.f32 %v2016_v18, %v1117_v2  ;;  %2211 = vmatprep.subr.bf16.mxu1 %v2178_v51  ;;  %2181 = vmatpush3.bf16.msra.mxu0 %v2178_v51 }
 0x16e   : > { %2183 = vmatprep.subr.bf16.mxu0 %v2182_v56 }
 0x16f   : > { %2053 = vmatmul.mubr.f32.gmra.mrb[6].mxu1 %v1207_v4 }
 0x170   : > { %2213 = vmatpush3.bf16.msra.mxu1 %v2178_v51 }
 0x171   : > { %2215 = vmatprep.subr.bf16.mxu1 %v2182_v56  ;;  %2185 = vmatpush3.bf16.msra.mxu0 %v2182_v56 }
 0x172   : > { %2187 = vmatprep.subr.bf16.mxu0 %v2186_v61 }
 0x174   : > { %2217 = vmatpush3.bf16.msra.mxu1 %v2182_v56 }
 0x175   : > { %2219 = vmatprep.subr.bf16.mxu1 %v2186_v61  ;;  %2189 = vmatpush3.bf16.msra.mxu0 %v2186_v61 }
 0x178   : > { %2221 = vmatpush3.bf16.msra.mxu1 %v2186_v61 }
 0x23a   : > { %v2051_v6 = vpop.f32.mrb[4].mxu1 }
 0x23b   : > { %v1296_v7 = vpop.f32.mrb[5].mxu1  ;;  %v1302_v9 = vadd.f32 %v2051_v6, %v1227_v60 }
 0x23c   : > { %v1297_v0 = vadd.f32 %v1296_v7, %v1226_v5 }
 0x23d   : > { %v1317_v13 = vsel %vm1315_vm3, %v1302_v9, -inf }
 0x23e   : > { %v1316_v10 = vsel %vm1315_vm3, %v1297_v0, -inf }
 0x23f   : > { %1320 = vmax.xlane.f32.xlu0 %v1316_v10 }
 0x242   : > { %v2054_v12 = vpop.f32.mrb[6].mxu1 }
 0x243   : > { %v1306_v15 = vpop.f32.mrb[7].mxu1  ;;  %1322 = vmax.xlane.f32.xlu0 %v1317_v13  ;;  %v1312_v16 = vadd.f32 %v2054_v12, %v1229_v14 }
 0x244   : > { %v1307_v63 = vadd.f32 %v1306_v15, %v1228_v11 }
 0x245   : > { %v1319_v18 = vsel %vm1315_vm3, %v1312_v16, -inf  ;;  %v1431_v16 = vld [vmem:[%s2843_s10 + $0x50] sm:$0xff] }
 0x246   : > { %v1318_v53 = vsel %vm1315_vm3, %v1307_v63, -inf }
 0x247   : > { %1324 = vmax.xlane.f32.xlu1 %v1318_v53 }
 0x24b   : > { %1326 = vmax.xlane.f32.xlu1 %v1319_v18 }
 0x2cc   : > { %v1321_v19 = vpop.xlane.xlu0 %1320 }
 0x2cd   : > { %vm1328_vm4 = vcmp.ge.f32.partialorder %v1316_v10, %v1321_v19  ;;  %v1433_v19 = vld [vmem:[%s2843_s10 + $0x60] sm:$0xff] }
 0x2ce   : > { %v1332_v20 = vsel %vm1328_vm4, %v2709_v3, 128 }
 0x2cf   : > { %v1337_v21 = vshra.s32 %v1332_v20, 16  ;;  %v1336_v1 = vand.u32 65535, %v1332_v20  ;;  %v1434_v20 = vld [vmem:[%s2843_s10 + $0x68] sm:$0xff] }
 0x2d0   : > { %v1323_v22 = vpop.xlane.xlu0 %1322 }
 0x2d1   : > { %vm1329_vm5 = vcmp.ge.f32.partialorder %v1317_v13, %v1323_v22  ;;  %v1339_v25 = vcvt.s32.f32 %v1337_v21  ;;  %v1338_v5 = vcvt.s32.f32 %v1336_v1  ;;  %v2194_v21 = vpack.c.bf16 %v1434_v20, %v1433_v19  ;;  %v1435_v22 = vld [vmem:[%s2843_s10 + $0x70] sm:$0xff] }
 0x2d2   : > { %v1333_v28 = vsel %vm1329_vm5, %v2709_v3, 128 }
 0x2d3   : > { %1340 = vmin.xlane.f32.xlu0 %v1339_v25  ;;  %v1351_v29 = vshra.s32 %v1333_v28, 16  ;;  %v1350_v2 = vand.u32 65535, %v1333_v28 }
 0x2d4   : > { %v1325_v30 = vpop.xlane.xlu1 %1324 }
 0x2d5   : > { %vm1330_vm6 = vcmp.ge.f32.partialorder %v1318_v53, %v1325_v30  ;;  %v1353_v31 = vcvt.s32.f32 %v1351_v29  ;;  %v1352_v0 = vcvt.s32.f32 %v1350_v2  ;;  %v1432_v53 = vld [vmem:[%s2843_s10 + $0x58] sm:$0xff] }
 0x2d6   : > { %v1334_v32 = vsel %vm1330_vm6, %v2709_v3, 128 }
 0x2d7   : > { %1354 = vmin.xlane.f32.xlu1 %v1353_v31  ;;  %v1365_v33 = vshra.s32 %v1334_v32, 16  ;;  %v1364_v60 = vand.u32 65535, %v1334_v32 }
 0x2d8   : > { %v1327_v35 = vpop.xlane.xlu1 %1326 }
 0x2d9   : > { %vm1331_vm7 = vcmp.ge.f32.partialorder %v1319_v18, %v1327_v35  ;;  %v1367_v36 = vcvt.s32.f32 %v1365_v33  ;;  %v1366_v12 = vcvt.s32.f32 %v1364_v60  ;;  %v2190_v18 = vpack.c.bf16 %v1432_v53, %v1431_v16  ;;  %v1897_v35 = vld [vmem:[%s2844_s11] ss:$0 sm:$0xff] }
 0x2da   : > { %v1335_v37 = vsel %vm1331_vm7, %v2709_v3, 128 }
 0x2db   : > { %1368 = vmin.xlane.f32.xlu0 %v1367_v36  ;;  %v1379_v38 = vshra.s32 %v1335_v37, 16  ;;  %v1378_v10 = vand.u32 65535, %v1335_v37  ;;  %2191 = vmatprep.subr.bf16.mxu0 %v2190_v18 }
 0x2dc   : > { %2223 = vmatprep.subr.bf16.mxu1 %v2190_v18  ;;  %2193 = vmatpush3.bf16.msra.mxu0 %v2190_v18 }
 0x2dd   : > { %v1381_v39 = vcvt.s32.f32 %v1379_v38  ;;  %v1380_v15 = vcvt.s32.f32 %v1378_v10  ;;  %2225 = vmatpush3.bf16.msra.mxu1 %v2190_v18  ;;  %2195 = vmatprep.subr.bf16.mxu0 %v2194_v21 }
 0x2de   : > { %2227 = vmatprep.subr.bf16.mxu1 %v2194_v21 }
 0x2df   : > { %1382 = vmin.xlane.f32.xlu1 %v1381_v39 }
 0x2e0   : > { %2197 = vmatpush3.bf16.msra.mxu0 %v2194_v21 }
 0x2e1   : > { %2229 = vmatpush3.bf16.msra.mxu1 %v2194_v21 }
 0x360   : > { %v1341_v4 = vpop.xlane.xlu0 %1340 }
 0x361   : > { %vm1342_vm8 = vcmp.eq.f32.partialorder %v1339_v25, %v1341_v4  ;;  %v1436_v25 = vld [vmem:[%s2843_s10 + $0x78] sm:$0xff]  ;;  %v1347_v29 = vcvt.f32.s32 %v1341_v4 }
 0x362   : > { %v1343_v6 = vsel %vm1342_vm8, %v1338_v5, inf  ;;  %v2198_v28 = vpack.c.bf16 %v1436_v25, %v1435_v22 }
 0x363   : > { %1344 = vmin.xlane.f32.xlu0 %v1343_v6 }
 0x364   : > { %v1355_v7 = vpop.xlane.xlu1 %1354  ;;  %2199 = vmatprep.subr.bf16.mxu0 %v2198_v28  ;;  %2231 = vmatprep.subr.bf16.mxu1 %v2198_v28 }
 0x365   : > { %vm1356_vm9 = vcmp.eq.f32.partialorder %v1353_v31, %v1355_v7  ;;  %2201 = vmatpush3.bf16.msra.mxu0 %v2198_v28  ;;  %2233 = vmatpush3.bf16.msra.mxu1 %v2198_v28  ;;  %v1348_v31 = vshll.u32 %v1347_v29, 16  ;;  %v1361_v32 = vcvt.f32.s32 %v1355_v7 }
 0x366   : > { %v1357_v9 = vsel %vm1356_vm9, %v1352_v0, inf }
 0x367   : > { %1358 = vmin.xlane.f32.xlu1 %v1357_v9 }
 0x368   : > { %v1369_v11 = vpop.xlane.xlu0 %1368 }
 0x369   : > { %vm1370_vm10 = vcmp.eq.f32.partialorder %v1367_v36, %v1369_v11  ;;  %v1375_v37 = vcvt.f32.s32 %v1369_v11 }
 0x36a   : > { %v1371_v13 = vsel %vm1370_vm10, %v1366_v12, inf }
 0x36b   : > { %1372 = vmin.xlane.f32.xlu0 %v1371_v13  ;;  %v1376_v59 = vshll.u32 %v1375_v37, 16 }
 0x36c   : > { %v1383_v14 = vpop.xlane.xlu1 %1382 }
 0x36d   : > { %vm1384_vm11 = vcmp.eq.f32.partialorder %v1381_v39, %v1383_v14  ;;  %v1362_v39 = vshll.u32 %v1361_v32, 16  ;;  %v1389_v51 = vcvt.f32.s32 %v1383_v14 }
 0x36e   : > { %v1385_v63 = vsel %vm1384_vm11, %v1380_v15, inf }
 0x36f   : > { %1386 = vmin.xlane.f32.xlu1 %v1385_v63  ;;  %v1390_v61 = vshll.u32 %v1389_v51, 16 }
 0x3f0   : > { %v1345_v30 = vpop.xlane.xlu0 %1344 }
 0x3f1   : > { %v1346_v33 = vcvt.f32.s32 %v1345_v30 }
 0x3f3   : > { %v1349_v36 = vadd.s32 %v1348_v31, %v1346_v33 }
 0x3f4   : > { %v1359_v38 = vpop.xlane.xlu1 %1358 }
 0x3f5   : > { %vm1392_vm12 = vcmp.eq.s32.totalorder %v2709_v3, %v1349_v36  ;;  %vm1409_vm13 = vcmp.eq.s32.totalorder %v1897_v35, %v1349_v36  ;;  %v1360_v42 = vcvt.f32.s32 %v1359_v38 }
 0x3f6   : > { %v1893_v43 = vsel %vm1392_vm12, 1.0, %v2353_v8  ;;  %v1898_v44 = vsel %vm1409_vm13, 1.0, %v2353_v8 }
 0x3f7   : > { %1623 = vst [vmem:[%s2775_s24] sm:$0xff] %v1893_v43  ;;  %v1363_v45 = vadd.s32 %v1362_v39, %v1360_v42  ;;  %v1441_v46 = vmul.f32 %v1898_v44, %v2676_v26  ;;  %v1437_v48 = vmul.f32 %v1898_v44, %v2683_v41 }
 0x3f8   : > { %v1373_v50 = vpop.xlane.xlu0 %1372 }
 0x3f9   : > { %vm1393_vm14 = vcmp.eq.s32.totalorder %v2709_v3, %v1363_v45  ;;  %vm1410_vm15 = vcmp.eq.s32.totalorder %v1897_v35, %v1363_v45  ;;  %v1374_v52 = vcvt.f32.s32 %v1373_v50  ;;  %2087 = vmatprep.mubr.f32.mxu0 %v1441_v46  ;;  %2125 = vmatprep.mubr.f32.mxu1 %v1437_v48 }
 0x3fa   : > { %v1894_v54 = vsel %vm1393_vm14, 1.0, %v2353_v8  ;;  %v1899_v56 = vsel %vm1410_vm15, 1.0, %v2353_v8 }
 0x3fb   : > { %v1438_v57 = vmul.f32 %v1899_v56, %v2691_v47  ;;  %v1442_v26 = vmul.f32 %v1899_v56, %v2678_v34  ;;  %1624 = vst [vmem:[%s2775_s24 + $0x8] sm:$0xff] %v1894_v54  ;;  %v1377_v41 = vadd.s32 %v1376_v59, %v1374_v52 }
 0x3fc   : > { %v1387_v58 = vpop.xlane.xlu1 %1386 }
 0x3fd   : > { %vm1394_vm1 = vcmp.eq.s32.totalorder %v2709_v3, %v1377_v41  ;;  %vm1411_vm2 = vcmp.eq.s32.totalorder %v1897_v35, %v1377_v41  ;;  %v1388_v1 = vcvt.f32.s32 %v1387_v58  ;;  %2088 = vmatmul.mubr.f32.vlgmr.msra.gmra.mrb[20].mxu0 %v1442_v26  ;;  %2126 = vmatmul.mubr.f32.vlgmr.msra.gmra.mrb[8].mxu1 %v1438_v57 }
 0x3fe   : > { %v1895_v2 = vsel %vm1394_vm1, 1.0, %v2353_v8  ;;  %v1900_v4 = vsel %vm1411_vm2, 1.0, %v2353_v8 }
 0x3ff   : > { %1625 = vst [vmem:[%s2775_s24 + $0x10] sm:$0xff] %v1895_v2  ;;  %v1391_v5 = vadd.s32 %v1390_v61, %v1388_v1  ;;  %v1443_v47 = vmul.f32 %v1900_v4, %v2685_v40  ;;  %v1439_v34 = vmul.f32 %v1900_v4, %v2699_v55 }
 0x401   : > { %vm1395_vm3 = vcmp.eq.s32.totalorder %v2709_v3, %v1391_v5  ;;  %vm1412_vm4 = vcmp.eq.s32.totalorder %v1897_v35, %v1391_v5  ;;  %2090 = vmatprep.mubr.f32.mxu0 %v1443_v47  ;;  %2128 = vmatprep.mubr.f32.mxu1 %v1439_v34 }
 0x402   : > { %v1896_v6 = vsel %vm1395_vm3, 1.0, %v2353_v8  ;;  %v1901_v60 = vsel %vm1412_vm4, 1.0, %v2353_v8 }
 0x403   : > { %1626 = vst [vmem:[%s2775_s24 + $0x18] sm:$0xff] %v1896_v6  ;;  %v1444_v7 = vmul.f32 %v1901_v60, %v2693_v49  ;;  %v1440_v0 = vmul.f32 %v1901_v60, %v2705_v62 }
 0x405   : > { %2091 = vmatmul.mubr.f32.gmra.mrb[22].mxu0 %v1444_v7  ;;  %2129 = vmatmul.mubr.f32.gmra.mrb[10].mxu1 %v1440_v0 }
 0x4d0   : > { %v2089_v40 = vpop.f32.mrb[20].mxu0  ;;  %v2127_v9 = vpop.f32.mrb[8].mxu1 }
 0x4d1   : > { %v1531_v55 = vmul.f32 %v2089_v40, %v2562_v23  ;;  %v1511_v3 = vpop.f32.mrb[21].mxu0  ;;  %v1600_v10 = vpop.f32.mrb[9].mxu1 }
 0x4d2   : > { %v1530_v11 = vmul.f32 %v1511_v3, %v2551_v17 }
 0x4d3   : > { %v1606_v12 = vadd.f32 %v2127_v9, %v1531_v55 }
 0x4d4   : > { %v1601_v13 = vadd.f32 %v1600_v10, %v1530_v11 }
 0x4d5   : > { %1620 = vst.msk [vmem:[%s573_s14 + $0x8] sm:$0xff] %vm777_vm0, %v1606_v12 }
 0x4d6   : > { %1619 = vst.msk [vmem:[%s573_s14] sm:$0xff] %vm777_vm0, %v1601_v13 }
 0x4d8   : > { %v2092_v8 = vpop.f32.mrb[22].mxu0  ;;  %v2130_v49 = vpop.f32.mrb[10].mxu1  ;;  %1637 = sbr.rel (!%p2866_p13) target bundleno = 1255 (0x4e7), region = 152 }
 0x4d9   : > { %v1533_v62 = vmul.f32 %v2092_v8, %v2580_v27  ;;  %v1521_v14 = vpop.f32.mrb[23].mxu0  ;;  %v1610_v15 = vpop.f32.mrb[11].mxu1 }
 0x4da   : > { %v1532_v63 = vmul.f32 %v1521_v14, %v2569_v24 }
 0x4db   : > { %v1616_v23 = vadd.f32 %v2130_v49, %v1533_v62 }
 0x4dc   : > { %v1611_v16 = vadd.f32 %v1610_v15, %v1532_v63  ;;  %v1675_v53 = vld [vmem:[%s573_s14 + $0x8] sm:$0xff] (%p2866_p13) }
 0x4dd   : > { %1622 = vst.msk [vmem:[%s573_s14 + $0x18] sm:$0xff] %vm777_vm0, %v1616_v23  ;;  %v1673_v17 = vld [vmem:[%s573_s14] sm:$0xff] (%p2866_p13)  ;;  %1676 = vst [vmem:[%s1639_s25 + $0x10] sm:$0xff] (%p2866_p13), %v1675_v53 }
 0x4de   : > { %1621 = vst.msk [vmem:[%s573_s14 + $0x10] sm:$0xff] %vm777_vm0, %v1611_v16  ;;  %1674 = vst [vmem:[%s1639_s25] sm:$0xff] (%p2866_p13), %v1673_v17 }
 0x4e4   : > { %v1679_v27 = vld [vmem:[%s573_s14 + $0x18] sm:$0xff] }
 0x4e5   : > { %v1677_v18 = vld [vmem:[%s573_s14 + $0x10] sm:$0xff]  ;;  %1680 = vst [vmem:[%s1639_s25 + $0x30] sm:$0xff] %v1679_v27 }
 0x4e6   : > { %1678 = vst [vmem:[%s1639_s25 + $0x20] sm:$0xff] %v1677_v18 }
 0x4e7 PF: > { %p2867_p1 = scmp.ne.s32.totalorder %s2856_s17, 0 }
 0x4e8   : > { %s1905_s19 = sshll.u32 (%p2867_p1), %s2442_s28, 3  ;;  %v1722_v24 = vld [vmem:[%s2775_s24] sm:$0xff] (%p2867_p1)  ;;  %v1724_v19 = vld [vmem:[%s2775_s24 + $0x8] sm:$0xff] (%p2867_p1)  ;;  %v1726_v20 = vld [vmem:[%s2775_s24 + $0x10] sm:$0xff] (%p2867_p1) }
 0x4e9   : > { %1686 = sbr.rel (!%p2867_p1) target bundleno = 1264 (0x4f0), region = 190  ;;  %s1688_s23 = scalar_lea.vmem (%p2867_p1), %s2846_s13, %s1905_s19  ;;  %v1728_v21 = vld [vmem:[%s2775_s24 + $0x18] sm:$0xff] (%p2867_p1) }
 0x4ea   : > { %1723 = vst [vmem:[%s1688_s23] sm:$0xff] (%p2867_p1), %v1722_v24  ;;  %1725 = vst [vmem:[%s1688_s23 + $0x10] sm:$0xff] (%p2867_p1), %v1724_v19 }
 0x4eb   : > { %1727 = vst [vmem:[%s1688_s23 + $0x20] sm:$0xff] (%p2867_p1), %v1726_v20  ;;  %1729 = vst [vmem:[%s1688_s23 + $0x30] sm:$0xff] (%p2867_p1), %v1728_v21 }
 0x4f0 PF: > { %s2868_s27 = sld [smem:[#allocation9_spill]]  ;;  %s2869_s17 = sld [smem:[#allocation10_spill]] }
 0x4f1   : > { %s2870_s25 = smov %s2346_s26 }
 0x4f6   : > { %p22_p2 = scmp.ge.s32.totalorder %s2868_s27, 4   ;;  %s2871_s26 = smov %s2869_s17 }
 0x4f8   :  { %24 = sbr.rel (!%p22_p2) target bundleno = 5 (0x5), region = 283 }
 0x4ff   :  { %1752 = vsyncpa [#allocation5], 1 }
 0x500   :  { %1754 = vsyncpa [#allocation5 + $0x1], 1 }

</bundles_post_ra>
